<compile_context>
chip_gen: v7x
topology: tpu7x:2x2x1
jax: 0.10.0
libtpu: 0.0.40
codegen_flags: <defaults>
</compile_context>

<pallas_src>
import functools
import math

import numpy as np
import jax
import jax.numpy as jnp
from jax.experimental import pallas as pl
from jax.experimental.pallas import tpu as pltpu


def _interp_matrix_align_corners(in_size: int, out_size: int) -> np.ndarray:
    """1-D interp matrix R (out_size, in_size) matching F.interpolate(...,
    mode='bilinear', align_corners=True) along one axis."""
    R = np.zeros((out_size, in_size), dtype=np.float32)
    if out_size == 1:
        R[0, 0] = 1.0
        return R
    scale = (in_size - 1) / (out_size - 1)
    for i in range(out_size):
        src = i * scale
        lo = min(int(np.floor(src)), in_size - 1)
        hi = min(lo + 1, in_size - 1)
        lam = src - lo
        R[i, lo] += 1.0 - lam
        R[i, hi] += lam
    return R


def _seq_consistency_kernel(w_ref, x_ref, rwT_ref, rh_ref, out_ref, prev_ref, *,
                            tm: int, H: int, Hp_pad: int, Wp_pad: int,
                            m_chunk: int, compute_dtype):
    """One grid step = (one M-tile, one sequence element n).

    w_ref   : (N,)                 f32 SMEM  scalar-prefetch gamma weights (w[0] unused)
    x_ref   : (tm*H, W)            cdt VMEM  current sequence element, one M-tile
    rwT_ref : (W, Wp_pad)          cdt VMEM  W-resize matrix (transposed, zero-padded cols)
    rh_ref  : (Hp_pad, H)          cdt VMEM  H-resize matrix (zero-padded rows)
    out_ref : (8, 128)             f32 VMEM  per-tile weighted-loss accumulator
    prev_ref: (tm, Hp_pad, Wp_pad) f32 VMEM  carry: previous step's resized maps
    """
    n = pl.program_id(1)

    # Rh broadcast over the chunk batch, hoisted out of the loop (JAX does not
    # CSE broadcast_in_dim).  Small: m_chunk * Hp_pad * H elements.
    rh_b = jnp.broadcast_to(rh_ref[...], (m_chunk, Hp_pad, H))

    # Chunked over m: keeps the resized slice, its diff and the W-resize
    # intermediate in small pieces instead of full-tile VMEM temps, and gives a
    # two-level f32 summation (per-chunk reduce, then cross-chunk scalar adds).
    total = jnp.float32(0.0)
    for c in range(tm // m_chunk):
        m0 = c * m_chunk
        x_slice = x_ref[m0 * H:(m0 + m_chunk) * H, :]              # (mc*H, W)
        y = jnp.dot(x_slice, rwT_ref[...],
                    preferred_element_type=jnp.float32)             # (mc*H, Wp_pad)
        y = y.reshape(m_chunk, H, Wp_pad).astype(compute_dtype)
        z = jnp.einsum("mph,mhq->mpq", rh_b, y,
                       preferred_element_type=jnp.float32)          # (mc, Hp_pad, Wp_pad)
        # At n == 0 prev_ref holds stale data; `d` is computed but discarded
        # (the accumulation below is gated on n > 0), which is safe on TPU.
        d = z - prev_ref[m0:m0 + m_chunk]
        total = total + jnp.sum(d * d)
        prev_ref[m0:m0 + m_chunk] = z

    @pl.when(n == 0)
    def _():
        out_ref[...] = jnp.zeros_like(out_ref)

    @pl.when(n > 0)
    def _():
        out_ref[...] = out_ref[...] + jnp.full(out_ref.shape,
                                               w_ref[n] * total, out_ref.dtype)


def _tpu_memory_profile():
    """Generation-aware VMEM sizing.

    v7x-class chips report <=64 MiB VMEM per TensorCore and have 2 TCs per chip
    (keep tiles small, even tile count); v5e/v6e report 128 MiB and have a
    single TC (use the biggest tile that fits, fewest grid steps)."""
    vmem = None
    try:
        info = pltpu.get_tpu_info()
        vmem = int(getattr(info, "vmem_capacity_bytes", 0)) or None
    except Exception:
        vmem = None
    if vmem is None:
        # Unknown chip: conservative settings, safe on every generation.
        return {"num_cores": 2, "tile_budget": 20 << 20, "vmem_limit": 32 << 20}
    if vmem <= (64 << 20):
        return {"num_cores": 2, "tile_budget": 20 << 20,
                "vmem_limit": min(vmem * 3 // 4, 48 << 20)}
    return {"num_cores": 1, "tile_budget": 64 << 20,
            "vmem_limit": min(vmem * 3 // 4, 100 << 20)}


def _choose_m_chunk(tm: int, H: int, Hp_pad: int, Wp_pad: int) -> int:
    """Largest divisor of tm whose per-chunk f32 working set (y + z + d) stays
    around the vreg-file scale, with the static unroll length bounded."""
    per_m = (H + 2 * Hp_pad) * Wp_pad * 4
    cap = max(1, (256 * 1024) // per_m)
    divs = [d for d in range(1, tm + 1) if tm % d == 0]
    fits = [d for d in divs if d <= cap]
    mc = max(fits) if fits else 1
    while tm // mc > 16:                       # bound static unroll length
        bigger = [d for d in divs if d > mc]
        if not bigger:
            break
        mc = min(bigger)
    return mc


def _choose_m_tile(M, H, W, Hp_pad, Wp_pad, *, budget_bytes, num_cores, itemsize):
    """Pick the M-tile (divisor of M) respecting layout alignment, the VMEM
    budget (with ~30% Mosaic headroom), and megacore balance on 2-TC chips."""
    sub = 8 if itemsize >= 4 else 16           # sublane multiple (dtype packing)

    def est(tm):
        mc = _choose_m_chunk(tm, H, Hp_pad, Wp_pad)
        b = 2 * tm * H * W * itemsize          # x tile, double-buffered
        b += W * Wp_pad * itemsize             # RwT (Buffered(1): single buffer)
        b += Hp_pad * H * itemsize             # Rh  (Buffered(1): single buffer)
        b += tm * Hp_pad * Wp_pad * 4          # prev carry (f32)
        b += mc * (H + 2 * Hp_pad) * Wp_pad * 4  # per-chunk y/z/d temps
        b += 2 * 8 * 128 * 4                   # output block
        return int(b * 1.3)                    # headroom for Mosaic scratch

    divs = [d for d in range(1, M + 1) if M % d == 0]
    aligned = [d for d in divs if d == M or (d * H) % sub == 0]
    fits = [d for d in aligned if est(d) <= budget_bytes]
    if not fits:
        return min(aligned)                    # correctness first: smallest tile
    if num_cores > 1:
        # Prefer an even number of tiles >= 2 so the "parallel" mt axis
        # load-balances across both TensorCores (odd counts give 2:1 skew).
        balanced = [d for d in fits if (M // d) >= 2 and (M // d) % num_cores == 0]
        if balanced:
            return max(balanced)
        multi = [d for d in fits if (M // d) >= 2]
        if multi:
            return max(multi)
    return max(fits)                           # single TC: biggest tile that fits


def flow_sequence_consistency_loss(flow_preds, gamma=0.8, resize_factor=0.25,
                                   rescale_factor=0.25, rescale_mode="bilinear",
                                   compute_dtype=jnp.bfloat16):
    assert rescale_factor <= 1.0, "rescale_factor must be <= 1"
    assert rescale_mode == "bilinear", "only bilinear is implemented"

    if isinstance(flow_preds, (list, tuple)):
        # TODO(synk): callers that already hold a stacked (N,B,C,H,W) buffer can
        # pass it directly to skip this HBM stack materialization.
        flows = jnp.stack([jnp.asarray(f) for f in flow_preds])
    else:
        flows = jnp.asarray(flow_preds)
    N, B, C, H, W = flows.shape
    M = B * C
    if N < 2:
        return jnp.zeros((), jnp.float32)      # no sequence pairs -> zero loss

    # Match PyTorch exactly: the resize is gated on `rescale_factor` (not
    # resize_factor); when it is falsy there is no resize and no scaling.
    if rescale_factor:
        Hp = int(math.floor(H * resize_factor))
        Wp = int(math.floor(W * resize_factor))
        Rh = _interp_matrix_align_corners(H, Hp)
        Rw = _interp_matrix_align_corners(W, Wp)
        scale = float(rescale_factor)
    else:
        Hp, Wp = H, W
        Rh = np.eye(H, dtype=np.float32)
        Rw = np.eye(W, dtype=np.float32)
        scale = 1.0
    assert Hp >= 1 and Wp >= 1

    # Lane / sublane padding (zero interp rows/cols contribute 0 to the loss).
    Hp_pad = ((Hp + 7) // 8) * 8
    Wp_pad = ((Wp + 127) // 128) * 128

    itemsize = np.dtype(compute_dtype).itemsize
    prof = _tpu_memory_profile()
    tm = _choose_m_tile(M, H, W, Hp_pad, Wp_pad,
                        budget_bytes=prof["tile_budget"],
                        num_cores=prof["num_cores"], itemsize=itemsize)
    m_chunk = _choose_m_chunk(tm, H, Hp_pad, Wp_pad)
    n_mt = M // tm

    rwT = np.zeros((W, Wp_pad), np.float32)
    rwT[:, :Wp] = Rw.T
    rh = np.zeros((Hp_pad, H), np.float32)
    rh[:Hp, :] = Rh
    # gamma weights indexed by the sequence grid step n (w_host[0] unused).
    w_host = np.zeros((N,), np.float32)
    w_host[1:] = (gamma ** np.arange(N - 2, -1, -1, dtype=np.float64)
                  ).astype(np.float32)

    # Rows ordered (b, c, h) major->minor; W stays the lane axis.  Streaming in
    # compute_dtype (bf16 default) halves the dominant HBM read.
    x2d = flows.reshape(N, M * H, W).astype(compute_dtype)
    rwT_dev = jnp.asarray(rwT).astype(compute_dtype)
    rh_dev = jnp.asarray(rh).astype(compute_dtype)
    w_dev = jnp.asarray(w_host)

    flops = n_mt * N * (2 * tm * H * W * Wp_pad
                        + 2 * tm * Hp_pad * H * Wp_pad
                        + 3 * tm * Hp_pad * Wp_pad)
    bytes_accessed = (N * M * H * W * itemsize
                      + (W * Wp_pad + Hp_pad * H) * itemsize
                      + N * 4 + n_mt * 8 * 128 * 4)

    kernel = functools.partial(_seq_consistency_kernel, tm=tm, H=H,
                               Hp_pad=Hp_pad, Wp_pad=Wp_pad, m_chunk=m_chunk,
                               compute_dtype=compute_dtype)

    # NOTE: prev_ref carries the previous sequence element's resized maps, so
    # the sequence axis MUST remain the innermost, "arbitrary" (sequential)
    # grid axis; only the M-tile axis may be sharded across TensorCores.
    out = pl.pallas_call(
        kernel,
        out_shape=jax.ShapeDtypeStruct((n_mt, 8, 128), jnp.float32),
        grid_spec=pltpu.PrefetchScalarGridSpec(
            num_scalar_prefetch=1,
            grid=(n_mt, N),
            in_specs=[
                pl.BlockSpec((None, tm * H, W), lambda mt, n, ws: (n, mt, 0)),
                pl.BlockSpec((W, Wp_pad), lambda mt, n, ws: (0, 0),
                             pipeline_mode=pl.Buffered(1)),
                pl.BlockSpec((Hp_pad, H), lambda mt, n, ws: (0, 0),
                             pipeline_mode=pl.Buffered(1)),
            ],
            out_specs=pl.BlockSpec((None, 8, 128), lambda mt, n, ws: (mt, 0, 0)),
            scratch_shapes=[pltpu.VMEM((tm, Hp_pad, Wp_pad), jnp.float32)],
        ),
        compiler_params=pltpu.CompilerParams(
            dimension_semantics=("parallel", "arbitrary"),
            vmem_limit_bytes=int(prof["vmem_limit"])),
        cost_estimate=pl.CostEstimate(flops=int(flops), transcendentals=0,
                                      bytes_accessed=int(bytes_accessed)),
    )(w_dev, x2d, rwT_dev, rh_dev)

    # Tiny epilogue: sum the per-tile weighted pair sums, apply rescale**2 and
    # the mean denominator (gamma weights were applied in-kernel).
    loss = jnp.sum(out[:, 0, 0]) * (scale * scale) / float(M * Hp * Wp)
    return loss.astype(jnp.float32)


class FlowSequenceConsistencyLoss:
    """JAX/Pallas port of the PyTorch module (forward pass only)."""

    def __init__(self, gamma=0.8, resize_factor=0.25, rescale_factor=0.25,
                 rescale_mode="bilinear", compute_dtype=jnp.bfloat16):
        self.gamma = gamma
        self.resize_factor = resize_factor
        self.rescale_factor = rescale_factor
        self.rescale_mode = rescale_mode
        self.compute_dtype = compute_dtype
        self._weights = None  # kept for parity with the PyTorch module

    def __call__(self, flow_preds):
        loss = flow_sequence_consistency_loss(
            flow_preds, gamma=self.gamma, resize_factor=self.resize_factor,
            rescale_factor=self.rescale_factor, rescale_mode=self.rescale_mode,
            compute_dtype=self.compute_dtype)
        num_pairs = len(flow_preds) - 1
        self._weights = (self.gamma ** np.arange(num_pairs - 1, -1, -1)
                         ).astype(np.float32)
        return loss


def _numpy_reference(flows_np, gamma, resize_factor, rescale_factor):
    """Independent (non-Pallas) reference of the PyTorch semantics."""
    N, B, C, H, W = flows_np.shape
    Hp = int(math.floor(H * resize_factor))
    Wp = int(math.floor(W * resize_factor))
    Rh = _interp_matrix_align_corners(H, Hp)
    Rw = _interp_matrix_align_corners(W, Wp)
    resized = np.einsum("ph,nbchw,qw->nbcpq", Rh, flows_np, Rw) * rescale_factor
    diff = (resized[1:] - resized[:-1]) ** 2
    per = diff.mean(axis=(1, 2, 3, 4))
    wts = gamma ** np.arange(N - 2, -1, -1, dtype=np.float64)
    return float((per * wts).sum())


if __name__ == "__main__":
    key = jax.random.PRNGKey(0)
    N, B, C, H, W = 4, 2, 2, 16, 16   # sequence of 4 flow maps, NCHW each
    keys = jax.random.split(key, N)
    flow_preds = [jax.random.normal(k, (B, C, H, W), dtype=jnp.float32)
                  for k in keys]

    ref = _numpy_reference(np.stack([np.asarray(f) for f in flow_preds]),
                           gamma=0.8, resize_factor=0.25, rescale_factor=0.25)

    # Exact f32 path: tight tolerance.
    loss_f32 = jax.block_until_ready(flow_sequence_consistency_loss(
        flow_preds, compute_dtype=jnp.float32))
    assert np.isfinite(float(loss_f32))
    np.testing.assert_allclose(float(loss_f32), ref, rtol=1e-4, atol=1e-6)

    # Default bf16-streamed path: tolerance covers bf16 rounding of the inputs
    # (the 16->4 align_corners interpolation weights are exactly 0/1 here).
    loss_mod = FlowSequenceConsistencyLoss()
    loss = jax.block_until_ready(loss_mod(flow_preds))
    assert np.isfinite(float(loss))
    np.testing.assert_allclose(float(loss), ref, rtol=1e-2, atol=1e-5)

    print("KERNEL_OK")
</pallas_src>

<mosaic_0001>
module attributes {stable_mosaic.version = 11 : i64} {
  func.func @_seq_consistency_kernel(%arg0: i32, %arg1: i32, %arg2: memref<4xf32, #tpu.memory_space<smem>>, %arg3: memref<1x32x16xf32, #tpu.memory_space<vmem>>, %arg4: memref<16x128xf32, #tpu.memory_space<vmem>>, %arg5: memref<8x16xf32, #tpu.memory_space<vmem>>, %arg6: memref<1x8x128xf32, #tpu.memory_space<vmem>>, %arg7: memref<2x8x128xf32, #tpu.memory_space<vmem>>) attributes {dimension_semantics = [#tpu.dimension_semantics<parallel>, #tpu.dimension_semantics<arbitrary>], iteration_bounds = array<i64: 2, 4>, scalar_prefetch = 1 : i64, scratch_operands = 1 : i64, tpu.core_type = #tpu.core_type<tc>, window_params = [{transform_indices = @transform_0, window_bounds = array<i64: 1, 32, 16>}, {pipeline_mode = #tpu.pipeline_mode<synchronous>, transform_indices = @transform_1, window_bounds = array<i64: 16, 128>}, {pipeline_mode = #tpu.pipeline_mode<synchronous>, transform_indices = @transform_2, window_bounds = array<i64: 8, 16>}, {transform_indices = @transform_3, window_bounds = array<i64: 1, 8, 128>}]} {
    %c0 = arith.constant 0 : index
    %c0_0 = arith.constant 0 : index
    %0 = vector.load %arg5[%c0, %c0_0] : memref<8x16xf32, #tpu.memory_space<vmem>>, vector<8x16xf32>
    %1 = vector.shape_cast %0 : vector<8x16xf32> to vector<1x8x16xf32>
    %2 = vector.broadcast %1 : vector<1x8x16xf32> to vector<2x8x16xf32>
    %c0_1 = arith.constant 0 : index
    %c0_2 = arith.constant 0 : index
    %c0_3 = arith.constant 0 : index
    %3 = vector.load %arg3[%c0_1, %c0_2, %c0_3] : memref<1x32x16xf32, #tpu.memory_space<vmem>>, vector<1x32x16xf32>
    %4 = vector.shape_cast %3 : vector<1x32x16xf32> to vector<32x16xf32>
    %c0_4 = arith.constant 0 : index
    %c0_5 = arith.constant 0 : index
    %5 = vector.load %arg4[%c0_4, %c0_5] : memref<16x128xf32, #tpu.memory_space<vmem>>, vector<16x128xf32>
    %cst = arith.constant dense<0.000000e+00> : vector<32x128xf32>
    %6 = tpu.matmul %4, %5, %cst {dimension_numbers = #tpu.dot_dimension_numbers<[1], [0], [0], [1], [0, 0, 1, 1], [], []>} : vector<32x16xf32>, vector<16x128xf32>, vector<32x128xf32> -> vector<32x128xf32>
    %7 = vector.shape_cast %6 : vector<32x128xf32> to vector<2x16x128xf32>
    "tpu.trace_start"() <{level = 10 : i32, message = "mph,mhq->mpq"}> : () -> ()
    %cst_6 = arith.constant dense<0.000000e+00> : vector<2x8x128xf32>
    %8 = tpu.matmul %2, %7, %cst_6 {dimension_numbers = #tpu.dot_dimension_numbers<[2], [1], [1], [2], [0, 0, 0, 1, 1, 2], [0], [0]>} : vector<2x8x16xf32>, vector<2x16x128xf32>, vector<2x8x128xf32> -> vector<2x8x128xf32>
    "tpu.trace_stop"() : () -> ()
    %c0_7 = arith.constant 0 : index
    %c0_8 = arith.constant 0 : index
    %c0_9 = arith.constant 0 : index
    %9 = vector.load %arg7[%c0_7, %c0_8, %c0_9] : memref<2x8x128xf32, #tpu.memory_space<vmem>>, vector<2x8x128xf32>
    %10 = arith.subf %8, %9 : vector<2x8x128xf32>
    %11 = arith.mulf %10, %10 : vector<2x8x128xf32>
    %12 = vector.shape_cast %11 : vector<2x8x128xf32> to vector<1x2x8x128xf32>
    %cst_10 = arith.constant dense<0.000000e+00> : vector<1xf32>
    %13 = vector.multi_reduction <add>, %12, %cst_10 [1, 2, 3] : vector<1x2x8x128xf32> to vector<1xf32>
    %14 = vector.shape_cast %13 : vector<1xf32> to vector<1x1x1x1xf32>
    %15 = vector.extract %14[0, 0, 0, 0] : f32 from vector<1x1x1x1xf32>
    %cst_11 = arith.constant 0.000000e+00 : f32
    %16 = arith.addf %cst_11, %15 : f32
    %c0_12 = arith.constant 0 : index
    %c0_13 = arith.constant 0 : index
    %c0_14 = arith.constant 0 : index
    %17 = vector.load %arg7[%c0_12, %c0_13, %c0_14] : memref<2x8x128xf32, #tpu.memory_space<vmem>>, vector<2x8x128xf32>
    tpu.vector_store %arg7[%c0_12, %c0_13, %c0_14], %8 {strides = array<i32>} : memref<2x8x128xf32, #tpu.memory_space<vmem>>, vector<2x8x128xf32>,
    %c0_i32 = arith.constant 0 : i32
    %18 = arith.cmpi eq, %arg1, %c0_i32 : i32
    %19 = arith.extui %18 : i1 to i32
    %c0_i32_15 = arith.constant 0 : i32
    %20 = arith.cmpi ne, %19, %c0_i32_15 : i32
    scf.if %20 {
      %cst_18 = arith.constant 0.000000e+00 : f32
      %24 = vector.broadcast %cst_18 : f32 to vector<8x128xf32>
      %c0_19 = arith.constant 0 : index
      %c0_20 = arith.constant 0 : index
      %c0_21 = arith.constant 0 : index
      %25 = vector.load %arg6[%c0_19, %c0_20, %c0_21] : memref<1x8x128xf32, #tpu.memory_space<vmem>>, vector<1x8x128xf32>
      %26 = vector.shape_cast %25 : vector<1x8x128xf32> to vector<8x128xf32>
      %27 = vector.shape_cast %24 : vector<8x128xf32> to vector<1x8x128xf32>
      tpu.vector_store %arg6[%c0_19, %c0_20, %c0_21], %27 {strides = array<i32>} : memref<1x8x128xf32, #tpu.memory_space<vmem>>, vector<1x8x128xf32>,
    } else {
    }
    %c0_i32_16 = arith.constant 0 : i32
    %21 = arith.cmpi sgt, %arg1, %c0_i32_16 : i32
    %22 = arith.extui %21 : i1 to i32
    %c0_i32_17 = arith.constant 0 : i32
    %23 = arith.cmpi ne, %22, %c0_i32_17 : i32
    scf.if %23 {
      %c0_18 = arith.constant 0 : index
      %c0_19 = arith.constant 0 : index
      %c0_20 = arith.constant 0 : index
      %24 = vector.load %arg6[%c0_18, %c0_19, %c0_20] : memref<1x8x128xf32, #tpu.memory_space<vmem>>, vector<1x8x128xf32>
      %25 = vector.shape_cast %24 : vector<1x8x128xf32> to vector<8x128xf32>
      %26 = arith.index_cast %arg1 : i32 to index
      %27 = memref.load %arg2[%26] : memref<4xf32, #tpu.memory_space<smem>>
      %28 = arith.mulf %27, %16 : f32
      %29 = vector.broadcast %28 : f32 to vector<8x128xf32>
      %30 = arith.addf %25, %29 : vector<8x128xf32>
      %c0_21 = arith.constant 0 : index
      %c0_22 = arith.constant 0 : index
      %c0_23 = arith.constant 0 : index
      %31 = vector.load %arg6[%c0_21, %c0_22, %c0_23] : memref<1x8x128xf32, #tpu.memory_space<vmem>>, vector<1x8x128xf32>
      %32 = vector.shape_cast %31 : vector<1x8x128xf32> to vector<8x128xf32>
      %33 = vector.shape_cast %30 : vector<8x128xf32> to vector<1x8x128xf32>
      tpu.vector_store %arg6[%c0_21, %c0_22, %c0_23], %33 {strides = array<i32>} : memref<1x8x128xf32, #tpu.memory_space<vmem>>, vector<1x8x128xf32>,
    } else {
    }
    return
  }
  func.func @transform_0(%arg0: i32, %arg1: i32, %arg2: memref<4xf32, #tpu.memory_space<smem>>) -> (i32, i32, i32) {
    %c0_i32 = arith.constant 0 : i32
    %c0_i32_0 = arith.constant 0 : i32
    return %arg1, %arg0, %c0_i32 : i32, i32, i32
  }
  func.func @transform_1(%arg0: i32, %arg1: i32, %arg2: memref<4xf32, #tpu.memory_space<smem>>) -> (i32, i32) {
    %c0_i32 = arith.constant 0 : i32
    %c0_i32_0 = arith.constant 0 : i32
    %c0_i32_1 = arith.constant 0 : i32
    return %c0_i32, %c0_i32_0 : i32, i32
  }
  func.func @transform_2(%arg0: i32, %arg1: i32, %arg2: memref<4xf32, #tpu.memory_space<smem>>) -> (i32, i32) {
    %c0_i32 = arith.constant 0 : i32
    %c0_i32_0 = arith.constant 0 : i32
    %c0_i32_1 = arith.constant 0 : i32
    return %c0_i32, %c0_i32_0 : i32, i32
  }
  func.func @transform_3(%arg0: i32, %arg1: i32, %arg2: memref<4xf32, #tpu.memory_space<smem>>) -> (i32, i32, i32) {
    %c0_i32 = arith.constant 0 : i32
    %c0_i32_0 = arith.constant 0 : i32
    %c0_i32_1 = arith.constant 0 : i32
    return %arg0, %c0_i32, %c0_i32_0 : i32, i32, i32
  }
}

</mosaic_0001>

<bundles_post_ra>
// kernel: tpu_custom_call.1
= control target key start
LH: loop header
LB: loop body
LE: loop exit
PB: predicated region body
PF: predicated region fallthrough
CT: control target
= control target key end

     0   :  { %s1017_s0 = inlined_call_operand.vmem [shape: f32[4], index: 0, kind: input, shape index: {}]   ;;  %s1018_s1 = inlined_call_operand.vmem [shape: f32[4,64,16], index: 1, kind: input, shape index: {}]   ;;  %s1019_s2 = inlined_call_operand.vmem [shape: f32[16,128], index: 2, kind: input, shape index: {}]   ;;  %s1020_s3 = inlined_call_operand.vmem [shape: f32[8,16], index: 3, kind: input, shape index: {}]   ;;  %s1021_s4 = inlined_call_operand.hbm [shape: f32[2,8,128], index: 4, kind: output, shape index: {}]  }
   0x1   :  { %s9_s17 = sshll.u32 %s1017_s0, 4  ;;  %s10_s17 = int_to_ptr.vmem [resolvable:$true] %s9_s17 }
   0x2   :  { %s721_s18 = scalar_lea.vmem %s10_s17, 16  ;;  %p726_p1 = scmp.lt.s32.totalorder %s10_s17, %s10_s17 }
   0x3   :  { %p722_p0 = scmp.ne.s32.totalorder %s10_s17, %s721_s18  ;;  %p727_p2 = scmp.lt.s32.totalorder %s721_s18, %s721_s18 }
   0x5   :  { %p728_p3 = por %p727_p2, %p726_p1 }
   0x7   :  { %p729_p4 = pnand %p728_p3, %p722_p0 }
   0x9   :  { %732 = shalt.err (!%p729_p4)  }
   0xa   :  { %s831_s19 = smov [#allocation4]  }
   0xb   :  { %12 = dma.vmem_to_smem %s10_s17, 16, %s831_s19, [#allocation3] }
   0xc   :  { %793 = dma.done.wait [#allocation3], 16 }
   0xd   :  { %794 = vsyncadd [#allocation3], 4294967280 }
   0xe   :  { %14 = sfence }
   0xf   :  { %15 = vsyncpa [#allocation6], 0 }
  0x10   :  { %17 = vsyncpa [#allocation6 + $0x1], 0  ;;  %s865_s20 = smov 0   ;;  %s867_s21 = smov 0  }
  0x11   :  { %s869_s0 = smov 0   ;;  %s871_s22 = smov 0  }
  0x12   :  { %s873_s23 = smov 0   ;;  %s875_s24 = smov 0  }
  0x13   :  { %s877_s25 = smov 0   ;;  %s879_s26 = smov 0  }
  0x14 LB: > { %s576_s27 = sadd.s32 4294967295, %s829_s26   ;;  %s577_s28 = sadd.s32 4294967294, %s829_s26   ;;  %s829_s26 = sphi %s879_s26, %s23_s26   ;;  %s825_s25 = sphi %s877_s25, %s1030_s25   ;;  %s821_s24 = sphi %s875_s24, %s1029_s24   ;;  %s817_s23 = sphi %s873_s23, %s1028_s23   ;;  %s813_s22 = sphi %s871_s22, %s1027_s22   ;;  %s809_s0 = sphi %s869_s0, %s1026_s0   ;;  %s805_s21 = sphi %s867_s21, %s1025_s21   ;;  %s801_s20 = sphi %s865_s20, %s1024_s20  }
  0x15   : > { %s32_s29 = sadd.s32 1, %s821_s24  ;;  %s35_s30 = sadd.s32 1, %s825_s25 }
  0x16   : > { %p33_p5 = scmp.ge.s32.totalorder %s32_s29, 4  ;;  %p122_p6 = scmp.ne.s32.totalorder %s809_s0, %s805_s21 }
  0x17   : > { %p123_p7 = scmp.eq.s32.totalorder %s576_s27, 7  ;;  %p128_p9 = scmp.ne.s32.totalorder %s805_s21, %s801_s20 }
  0x18   : > { %s1032_s29 = smov (%p33_p5, %s32_s29), 0  ;;  %s1034_s30 = smov (!%p33_p5, %s35_s30), %s825_s25 }
  0x19   : > { %p914_p8 = por %p123_p7, %p122_p6  ;;  %p37_p10 = scmp.ge.s32.totalorder %s1034_s30, 2 }
  0x1a   : > { %p129_p11 = scmp.eq.s32.totalorder %s577_s28, 7  ;;  %p580_p12 = scmp.ge.s32.totalorder %s829_s26, 1 }
  0x1b   : > { %p166_p13 = scmp.lt.s32.totalorder %s829_s26, 9  ;;  %s1036_s30 = smov (%p37_p10, %s1034_s30), 0 }
  0x1c   : > { %p924_p0 = por %p129_p11, %p128_p9  ;;  %s109_s7 = ssub.s32 %s825_s25, %s1036_s30 }
  0x1d   : > { %p167_p1 = pnand %p580_p12, %p166_p13  ;;  %s112_s8 = sadd.s32 1, %s809_s0 }
  0x1e   : > { %p110_p2 = scmp.eq.s32.totalorder %s109_s7, 0  ;;  %s191_s10 = sand.u32 (!%p167_p1), 1, %s805_s21   ;;  %v209_v0 = vld [vmem:[%s1019_s2] sm:$0xff] (!%p167_p1)  ;;  %v210_v1 = vld [vmem:[%s1019_s2 + $0x8] sm:$0xff] (!%p167_p1)  ;;  %vm211_vm0 = vcmask (!%p167_p1), 130048   ;;  %v832_v7 = vmov (!%p167_p1), 0.0|0.0  }
  0x1f   : > { %170 = sbr.rel (%p167_p1) target bundleno = 727 (0x2d7), region = 32  ;;  %s582_s15 = sshll.u32 (!%p167_p1), %s817_s23, 2  ;;  %v633_v2 = vpack.c.bf16 (!%p167_p1), %v210_v1, %v209_v0  ;;  %637 = vmatprep.subr.bf16.mxu1 (!%p167_p1), %v832_v7  ;;  %vm833_vm1 = vmmov (!%p167_p1), 0   ;;  %v834_v8 = vmov (!%p167_p1), 0.0   ;;  %v204_v13 = vld [vmem:[%s1020_s3] sm:$0xff] (!%p167_p1)  ;;  %v453_v19 = vld [vmem:[#allocation2 + $0x8] sm:$0xff] (!%p167_p1) }
  0x20   : > { %s932_s9 = scalar_select %p110_p2, %s809_s0, %s112_s8  }
  0x21   : > { %s944_s16 = sshll.u32 (!%p167_p1), %s191_s10, 3  ;;  %p195_p3 = scmp.lt.s32.totalorder (!%p167_p1), %s813_s22, 3  ;;  %634 = vmatprep.subr.bf16.mxu0 (!%p167_p1), %v633_v2  ;;  %623 = vmatprep.mubr.msk.f32.mxu1 (!%p167_p1), %vm833_vm1, %v834_v8  ;;  %v452_v16 = vld [vmem:[#allocation2] sm:$0xff] (!%p167_p1) }
  0x22   : > { %p197_p4 = scmp.lt.s32.totalorder (!%p167_p1), %s582_s15, 7  ;;  %636 = vmatpush3.bf16.msra.mxu0 (!%p167_p1), %v633_v2  ;;  %s193_s14 = scalar_lea.vmem (!%p167_p1), [#allocation5], %s944_s16 }
  0x23   : > { %p591_p5 = scmp.ne.s32.totalorder (!%p167_p1), %s813_s22, 0 }
  0x26   : > { %s196_s17 = scalar_select %p195_p3, %s813_s22, 3 }
  0x27   : > { %s1038_s15 = smov (!%p197_p4, %s582_s15), 7  ;;  %v835_v34 = vmov (!%p591_p5), 0.0  }
  0x28   : > { %s583_s18 = sshll.u32 %s196_s17, 3  ;;  %475 = vst [vmem:[%s193_s14] sm:$0xff] (!%p591_p5), %v835_v34 }
  0x29   : > { %s200_s19 = sadd.s32 %s583_s18, %s1038_s15 }
  0x2a   : > { %s584_s27 = sshll.u32 %s200_s19, 3 }
  0x2b   : > { %s202_s8 = scalar_lea.vmem %s1018_s1, %s584_s27 }
  0x2c   : > { %v205_v3 = vld [vmem:[%s202_s8] sm:$0xff]  ;;  %v206_v4 = vld [vmem:[%s202_s8 + $0x8] sm:$0xff]  ;;  %v207_v5 = vld [vmem:[%s202_s8 + $0x10] sm:$0xff] }
  0x2d   : > { %613 = vmatprep.mubr.msk.f32.mxu0 %vm211_vm0, %v205_v3  ;;  %v208_v6 = vld [vmem:[%s202_s8 + $0x18] sm:$0xff] }
  0x2e   : > { %614 = vmatmul.mubr.msk.f32.vlgmr.msra.gmra.mrb[0].mxu0 %vm211_vm0, %v206_v4 }
  0x2f   : > { %616 = vmatprep.mubr.msk.f32.mxu0 %vm211_vm0, %v207_v5 }
  0x32   : > { %617 = vmatmul.mubr.msk.f32.gmra.mrb[2].mxu0 %vm211_vm0, %v208_v6 }
 0x101   : > { %v615_v9 = vpop.f32.mrb[0].mxu0 }
 0x102   : > { %v290_v10 = vpop.f32.mrb[1].mxu0 }
 0x103   : > { %v638_v11 = vpack.c.bf16 %v615_v9, %v290_v10 }
 0x105   : > { %v618_v12 = vpop.f32.mrb[2].mxu0  ;;  %639 = vmatpush3.bf16.msra.mxu1 %v638_v11 }
 0x106   : > { %v300_v14 = vpop.f32.mrb[3].mxu0  ;;  %640 = vmatprep.subr.bf16.mxu1 %v832_v7 }
 0x107   : > { %v641_v15 = vpack.c.bf16 %v618_v12, %v300_v14 }
 0x108   : > { %624 = vmatmul.mubr.msk.f32.vlgmr.msra.gmra.mrb[0].mxu1 %vm211_vm0, %v204_v13 }
 0x109   : > { %642 = vmatpush3.bf16.msra.mxu1 %v641_v15  ;;  %630 = vmatprep.mubr.msk.f32.mxu1 %vm833_vm1, %v834_v8 }
 0x10c   : > { %631 = vmatmul.mubr.msk.f32.vlgmr.msra.gmra.mrb[2].mxu1 %vm211_vm0, %v204_v13 }
 0x1db   : > { %v378_v17 = vpop.f32.mrb[0].mxu1 }
 0x1dc   : > { %469 = vst [vmem:[#allocation2] sm:$0xff] %v378_v17  ;;  %v625_v18 = vpop.f32.mrb[1].mxu1  ;;  %v454_v20 = vsub.f32 %v378_v17, %v452_v16 }
 0x1de   : > { %v456_v24 = vmul.f32 %v454_v20, %v454_v20 }
 0x1df   : > { %v448_v21 = vpop.f32.mrb[2].mxu1 }
 0x1e0   : > { %v455_v22 = vsub.f32 %v448_v21, %v453_v19  ;;  %470 = vst [vmem:[#allocation2 + $0x8] sm:$0xff] %v448_v21  ;;  %v632_v23 = vpop.f32.mrb[3].mxu1 }
 0x1e2   : > { %v457_v25 = vmul.f32 %v455_v22, %v455_v22 }
 0x1e4   : > { %v458_v26 = vadd.f32 %v457_v25, %v456_v24 }
 0x1e6   : > { %459 = vadd.xlane.f32.xlu0 %v458_v26 }
 0x273   : > { %v460_v27 = vpop.xlane.xlu0 %459 }
 0x274   : > { %v461_v28 = vrot.slane %v460_v27, 4 }
 0x276   : > { %v462_v29 = vadd.f32 %v461_v28, %v460_v27 }
 0x278   : > { %v463_v30 = vrot.slane %v462_v29, 2 }
 0x27a   : > { %v464_v31 = vadd.f32 %v463_v30, %v462_v29 }
 0x27c   : > { %v465_v32 = vrot.slane %v464_v31, 1 }
 0x27e   : > { %v466_v33 = vadd.f32 %v465_v32, %v464_v31 }
 0x280   : > { %643 = vpush %v466_v33 }
 0x2ab   : > { %474 = sbr.rel (%p591_p5) target bundleno = 690 (0x2b2), region = 36 }
 0x2b1   : > { %s644_s13 = spop %643 }
 0x2b2 PF: > { %p592_p6 = scmp.le.s32.totalorder %s813_s22, 0 }
 0x2b3   : > { %s481_s15 = sld [smem:[#allocation4 + %s813_s22]] (!%p592_p6)  ;;  %v480_v35 = vld [vmem:[%s193_s14] sm:$0xff] (!%p592_p6) }
 0x2b4   : > { %479 = sbr.rel (%p592_p6) target bundleno = 703 (0x2bf), region = 40 }
 0x2b9   : > { %s482_s17 = smul.f32 (!%p592_p6), %s644_s13, %s481_s15 }
 0x2bb   : > { %v483_v36 = vstv %s482_s17 }
 0x2bc   : > { %v484_v37 = vadd.f32 %v483_v36, %v480_v35 }
 0x2be   : > { %485 = vst [vmem:[%s193_s14] sm:$0xff] %v484_v37 }
 0x2bf PF: > { %s594_s16 = sshll.u32 %s817_s23, 7  ;;  %s500_s28 = sshll.u32 %s193_s14, 4  ;;  %s501_s28 = int_to_ptr.vmem [resolvable:$true] %s500_s28 }
 0x2c0   : > { %s968_s27 = scalar_lea.hbm %s1021_s4, %s594_s16  ;;  %s487_s7 = scalar_lea.sflag [#allocation6], %s191_s10 }
 0x2c1   : > { %s733_s22 = scalar_lea.vmem %s501_s28, 128  ;;  %s836_s8 = smov [#allocation5]  }
 0x2c2   : > { %p734_p7 = scmp.ne.s32.totalorder %s501_s28, %s733_s22  ;;  %s737_s11 = sshll.u32 %s836_s8, 4  ;;  %s738_s11 = int_to_ptr.vmem [resolvable:$false] %s737_s11 }
 0x2c3   : > { %s739_s12 = scalar_lea.vmem %s738_s11, 256  ;;  %p740_p11 = scmp.lt.s32.totalorder %s501_s28, %s738_s11 }
 0x2c4   : > { %p735_p9 = pnand %p734_p7, %p914_p8  ;;  %p741_p12 = scmp.lt.s32.totalorder %s739_s12, %s733_s22 }
 0x2c6   : > { %p736_p10 = pneg %p735_p9  ;;  %p742_p13 = por %p741_p12, %p740_p11 }
 0x2c8   : > { %p743_p1 = pnand %p742_p13, %p736_p10 }
 0x2ca   : > { %746 = shalt.err (!%p743_p1)
}
 0x2cb   : > { %s747_s23 = scalar_lea.hbm %s968_s27, 128  ;;  %s751_s14 = scalar_lea.hbm %s1021_s4, 256 }
 0x2cc   : > { %p748_p2 = scmp.ne.s32.totalorder %s968_s27, %s747_s23  ;;  %p752_p5 = scmp.lt.u32.totalorder %s968_s27, %s1021_s4 }
 0x2cd   : > { %p753_p6 = scmp.lt.u32.totalorder %s751_s14, %s747_s23  ;;  %p755_p9 = scmp.lt.u32.totalorder %s747_s23, %s968_s27 }
 0x2ce   : > { %p749_p3 = pnand %p748_p2, %p914_p8 }
 0x2cf   : > { %p754_p7 = por %p753_p6, %p752_p5 }
 0x2d0   : > { %p750_p4 = pneg %p749_p3 }
 0x2d1   : > { %p756_p10 = por %p755_p9, %p754_p7 }
 0x2d3   : > { %p757_p11 = pnand %p756_p10, %p750_p4 }
 0x2d5   : > { %760 = shalt.err (!%p757_p11)
}
 0x2d6   : > { %645 = dma.vmem_to_hbm [thread:$0]  (%p914_p8), %s501_s28, 128, %s968_s27, %s487_s7  }
 0x2d7 PF: > { %p651_p12 = scmp.ge.s32.totalorder %s829_s26, 2  ;;  %s512_s16 = sand.u32 1, %s801_s20  }
 0x2d8   : > { %s513_s18 = scalar_lea.sflag [#allocation6], %s512_s16 }
 0x2d9   : > { %p648_p13 = pnand %p651_p12, %p924_p0 }
 0x2db   : > { %796 = dma.done.wait (!%p648_p13), %s513_s18, 128  }
 0x2dc   : > { %798 = vsyncadd (!%p648_p13), %s513_s18, 4294967168  ;;  %s23_s26 = sadd.s32 1, %s829_s26   ;;  %s1024_s20 = smov %s805_s21 }
 0x2dd   : > { %p20_p1 = scmp.ge.s32.totalorder %s23_s26, 10   ;;  %s1025_s21 = smov %s809_s0 }
 0x2de   : > { %s1026_s0 = smov %s932_s9  ;;  %s1027_s22 = smov %s821_s24 }
 0x2df   : > { %s1028_s23 = smov %s825_s25  ;;  %s1029_s24 = smov %s1032_s29 }
 0x2e0   : > { %s1030_s25 = smov %s1036_s30  ;;  %22 = sbr.rel (!%p20_p1) target bundleno = 20 (0x14), region = 75 }
 0x2e7   :  { %518 = vsyncpa [#allocation6], 1 }
 0x2e8   :  { %520 = vsyncpa [#allocation6 + $0x1], 1 }

</bundles_post_ra>
